<compile_context>
chip_gen: v6e
topology: v6e:2x2x1
jax: 0.10.0
libtpu: 0.0.40
codegen_flags: <defaults>
</compile_context>

<pallas_src>
import functools

import jax
import jax.numpy as jnp
from jax.experimental import pallas as pl
from jax.experimental.pallas import tpu as pltpu

LANE = 128
SUBLANE = 8


def _round_up(x, m):
    return ((x + m - 1) // m) * m


def vanet_kernel(state_ref, w1_ref, b1_ref, wq_ref, bq_ref, out_ref, *,
                 action_dim):
    """q = relu(state @ W1 + b1) @ W_q + b_q  (dueling combine pre-folded)."""
    # Shared features on a lane-dense H_pad=128 hidden; padded columns are 0.
    h = jnp.dot(state_ref[...], w1_ref[...],
                preferred_element_type=jnp.float32)
    h = jnp.maximum(h + b1_ref[...], 0.0)
    # Head matmul with lane-dense K (=H_pad) and N (=HEAD_pad).  Only the
    # first `action_dim` columns carry real data; only those are stored, so
    # HBM writeback is (TB, action_dim) rather than a (TB, 128) slab.
    q = jnp.dot(h, wq_ref[...],
                preferred_element_type=jnp.float32) + bq_ref[...]
    out_ref[...] = q[:, :action_dim].astype(out_ref.dtype)


def fuse_and_fold_params(w1, b1, w2, b2, w3, b3):
    """One-time (init-time) padding + dueling fold.

    w1: (S, H); b1: (1, H); w2: (H, A); b2: (1, A); w3: (H, 1); b3: (1, 1).
    Returns lane-dense params:
      w1_p (S, H_pad), b1_p (1, H_pad), wq_p (H_pad, HEAD_pad), bq_p (1, HEAD_pad)
    where q = relu(x @ w1_p + b1_p) @ wq_p + bq_p reproduces the dueling net.
    """
    S, H = w1.shape
    A = w2.shape[1]
    H_pad = _round_up(H, LANE)
    HEAD_pad = _round_up(A, LANE)

    w1_p = jnp.zeros((S, H_pad), jnp.float32).at[:, :H].set(w1)
    b1_p = jnp.zeros((1, H_pad), jnp.float32).at[:, :H].set(b1)

    # Fold the dueling combine into the head (exact up to FP reassociation):
    #   q = V + (Adv - mean(Adv))
    #     = h @ ((W2 - mean_cols(W2)) + W3) + ((b2 - mean(b2)) + b3)
    w_q = (w2 - jnp.mean(w2, axis=1, keepdims=True)) + w3      # (H, A)
    b_q = (b2 - jnp.mean(b2, axis=1, keepdims=True)) + b3      # (1, A)

    wq_p = jnp.zeros((H_pad, HEAD_pad), jnp.float32).at[:H, :A].set(w_q)
    bq_p = jnp.zeros((1, HEAD_pad), jnp.float32).at[:, :A].set(b_q)
    return w1_p, b1_p, wq_p, bq_p


def _vmem_limit_bytes(tb, s, h_pad, head_pad, a):
    """Generous scoped-VMEM estimate (2x + headroom), capped for v7x."""
    f32 = 4
    io = 2 * tb * s * f32 + 2 * tb * a * f32                   # dbl-buffered state/out
    weights = 2 * (s * h_pad + h_pad + h_pad * head_pad + head_pad) * f32
    live = 2 * tb * max(h_pad, head_pad) * f32                  # h + head values
    est = 2 * (io + weights + live) + (2 << 20)
    return int(min(max(est, 16 << 20), 48 << 20))


def vanet_forward(state, fused_params, action_dim, *, tb_max=4096):
    """state: (B, S) f32.  Returns (B, action_dim) f32 q-values."""
    w1_p, b1_p, wq_p, bq_p = fused_params
    B, S = state.shape
    H_pad = w1_p.shape[1]
    HEAD_pad = wq_p.shape[1]

    # Batch tile: large (amortizes per-grid-step overhead) but capped so the
    # grid has >= 2 steps when B permits -- the "parallel" batch axis can then
    # split across v7x's two TensorCores.
    min_steps = 2
    if B >= min_steps * SUBLANE:
        TB = min(tb_max, _round_up(pl.cdiv(B, min_steps), SUBLANE))
    else:
        TB = _round_up(max(B, 1), SUBLANE)
    grid = (pl.cdiv(B, TB),)

    # NOTE: state's last dim (S) is lane-sparse; fine at S=4.  If state_dim
    # grows, pad S to a multiple of 8 at init (zero rows in W1) for cheaper
    # DMA descriptors.
    return pl.pallas_call(
        functools.partial(vanet_kernel, action_dim=action_dim),
        out_shape=jax.ShapeDtypeStruct((B, action_dim), jnp.float32),
        grid=grid,
        in_specs=[
            pl.BlockSpec((TB, S), lambda i: (i, 0)),             # state: tiled
            pl.BlockSpec((S, H_pad), lambda i: (0, 0)),          # W1: resident
            pl.BlockSpec((1, H_pad), lambda i: (0, 0)),          # b1: resident
            pl.BlockSpec((H_pad, HEAD_pad), lambda i: (0, 0)),   # W_q: resident
            pl.BlockSpec((1, HEAD_pad), lambda i: (0, 0)),       # b_q: resident
        ],
        # Store only the true action columns; no 128-wide slab + wrapper slice.
        out_specs=pl.BlockSpec((TB, action_dim), lambda i: (i, 0)),
        compiler_params=pltpu.CompilerParams(
            dimension_semantics=("parallel",),
            vmem_limit_bytes=_vmem_limit_bytes(TB, S, H_pad, HEAD_pad,
                                               action_dim)),
    )(state, w1_p, b1_p, wq_p, bq_p)


def init_params(key, state_dim, hidden_dim, action_dim):
    """Deterministic PyTorch-style init (uniform ±1/sqrt(fan_in)).
    Weights are stored transposed: (in_features, out_features)."""
    ks = jax.random.split(key, 6)

    def linear(kw, kb, fan_in, fan_out):
        bound = 1.0 / jnp.sqrt(jnp.float32(fan_in))
        w = jax.random.uniform(kw, (fan_in, fan_out), jnp.float32,
                               -bound, bound)
        b = jax.random.uniform(kb, (1, fan_out), jnp.float32, -bound, bound)
        return w, b

    w1, b1 = linear(ks[0], ks[1], state_dim, hidden_dim)
    w2, b2 = linear(ks[2], ks[3], hidden_dim, action_dim)
    w3, b3 = linear(ks[4], ks[5], hidden_dim, 1)
    return w1, b1, w2, b2, w3, b3


def vanet_reference(state, w1, b1, w2, b2, w3, b3):
    h = jax.nn.relu(state @ w1 + b1)
    adv = h @ w2 + b2
    val = h @ w3 + b3
    return val + (adv - adv.mean(axis=1, keepdims=True))


if __name__ == "__main__":
    batch, state_dim, hidden_dim, action_dim = 8, 4, 32, 2

    key = jax.random.PRNGKey(0)
    k_state, k_params = jax.random.split(key)

    state = jax.random.normal(k_state, (batch, state_dim), jnp.float32)
    params = init_params(k_params, state_dim, hidden_dim, action_dim)

    fused = fuse_and_fold_params(*params)

    q = vanet_forward(state, fused, action_dim)
    q = jax.block_until_ready(q)

    q_ref = vanet_reference(state, *params)
    assert q.shape == (batch, action_dim)
    assert jnp.allclose(q, q_ref, atol=1e-5, rtol=1e-5), "mismatch vs reference"

    print("KERNEL_OK")
</pallas_src>

<mosaic_0001>
module attributes {stable_mosaic.version = 11 : i64} {
  func.func @vanet_kernel(%arg0: i32, %arg1: memref<8x4xf32, #tpu.memory_space<vmem>>, %arg2: memref<4x128xf32, #tpu.memory_space<vmem>>, %arg3: memref<1x128xf32, #tpu.memory_space<vmem>>, %arg4: memref<128x128xf32, #tpu.memory_space<vmem>>, %arg5: memref<1x128xf32, #tpu.memory_space<vmem>>, %arg6: memref<8x2xf32, #tpu.memory_space<vmem>>) attributes {dimension_semantics = [#tpu.dimension_semantics<parallel>], iteration_bounds = array<i64: 1>, scalar_prefetch = 0 : i64, scratch_operands = 0 : i64, tpu.core_type = #tpu.core_type<tc>, window_params = [{transform_indices = @transform_0, window_bounds = array<i64: 8, 4>}, {pipeline_mode = #tpu.pipeline_mode<synchronous>, transform_indices = @transform_1, window_bounds = array<i64: 4, 128>}, {pipeline_mode = #tpu.pipeline_mode<synchronous>, transform_indices = @transform_2, window_bounds = array<i64: 1, 128>}, {pipeline_mode = #tpu.pipeline_mode<synchronous>, transform_indices = @transform_3, window_bounds = array<i64: 128, 128>}, {pipeline_mode = #tpu.pipeline_mode<synchronous>, transform_indices = @transform_4, window_bounds = array<i64: 1, 128>}, {transform_indices = @transform_5, window_bounds = array<i64: 8, 2>}]} {
    %c0 = arith.constant 0 : index
    %c0_0 = arith.constant 0 : index
    %0 = vector.load %arg1[%c0, %c0_0] : memref<8x4xf32, #tpu.memory_space<vmem>>, vector<8x4xf32>
    %c0_1 = arith.constant 0 : index
    %c0_2 = arith.constant 0 : index
    %1 = vector.load %arg2[%c0_1, %c0_2] : memref<4x128xf32, #tpu.memory_space<vmem>>, vector<4x128xf32>
    %cst = arith.constant dense<0.000000e+00> : vector<8x128xf32>
    %2 = tpu.matmul %0, %1, %cst {dimension_numbers = #tpu.dot_dimension_numbers<[1], [0], [0], [1], [0, 0, 1, 1], [], []>} : vector<8x4xf32>, vector<4x128xf32>, vector<8x128xf32> -> vector<8x128xf32>
    %c0_3 = arith.constant 0 : index
    %c0_4 = arith.constant 0 : index
    %3 = vector.load %arg3[%c0_3, %c0_4] : memref<1x128xf32, #tpu.memory_space<vmem>>, vector<1x128xf32>
    %4 = vector.broadcast %3 : vector<1x128xf32> to vector<8x128xf32>
    %5 = arith.addf %2, %4 : vector<8x128xf32>
    %cst_5 = arith.constant 0.000000e+00 : f32
    %6 = vector.broadcast %cst_5 : f32 to vector<8x128xf32>
    %7 = arith.maximumf %5, %6 : vector<8x128xf32>
    %c0_6 = arith.constant 0 : index
    %c0_7 = arith.constant 0 : index
    %8 = vector.load %arg4[%c0_6, %c0_7] : memref<128x128xf32, #tpu.memory_space<vmem>>, vector<128x128xf32>
    %cst_8 = arith.constant dense<0.000000e+00> : vector<8x128xf32>
    %9 = tpu.matmul %7, %8, %cst_8 {dimension_numbers = #tpu.dot_dimension_numbers<[1], [0], [0], [1], [0, 0, 1, 1], [], []>} : vector<8x128xf32>, vector<128x128xf32>, vector<8x128xf32> -> vector<8x128xf32>
    %c0_9 = arith.constant 0 : index
    %c0_10 = arith.constant 0 : index
    %10 = vector.load %arg5[%c0_9, %c0_10] : memref<1x128xf32, #tpu.memory_space<vmem>>, vector<1x128xf32>
    %11 = vector.broadcast %10 : vector<1x128xf32> to vector<8x128xf32>
    %12 = arith.addf %9, %11 : vector<8x128xf32>
    %13 = vector.extract_strided_slice %12 {offsets = [0, 0], sizes = [8, 2], strides = [1, 1]} : vector<8x128xf32> to vector<8x2xf32>
    %c0_11 = arith.constant 0 : index
    %c0_12 = arith.constant 0 : index
    %14 = vector.load %arg6[%c0_11, %c0_12] : memref<8x2xf32, #tpu.memory_space<vmem>>, vector<8x2xf32>
    tpu.vector_store %arg6[%c0_11, %c0_12], %13 {strides = array<i32>} : memref<8x2xf32, #tpu.memory_space<vmem>>, vector<8x2xf32>,
    return
  }
  func.func @transform_0(%arg0: i32) -> (i32, i32) {
    %c0_i32 = arith.constant 0 : i32
    %c0_i32_0 = arith.constant 0 : i32
    return %arg0, %c0_i32 : i32, i32
  }
  func.func @transform_1(%arg0: i32) -> (i32, i32) {
    %c0_i32 = arith.constant 0 : i32
    %c0_i32_0 = arith.constant 0 : i32
    %c0_i32_1 = arith.constant 0 : i32
    return %c0_i32, %c0_i32_0 : i32, i32
  }
  func.func @transform_2(%arg0: i32) -> (i32, i32) {
    %c0_i32 = arith.constant 0 : i32
    %c0_i32_0 = arith.constant 0 : i32
    %c0_i32_1 = arith.constant 0 : i32
    return %c0_i32, %c0_i32_0 : i32, i32
  }
  func.func @transform_3(%arg0: i32) -> (i32, i32) {
    %c0_i32 = arith.constant 0 : i32
    %c0_i32_0 = arith.constant 0 : i32
    %c0_i32_1 = arith.constant 0 : i32
    return %c0_i32, %c0_i32_0 : i32, i32
  }
  func.func @transform_4(%arg0: i32) -> (i32, i32) {
    %c0_i32 = arith.constant 0 : i32
    %c0_i32_0 = arith.constant 0 : i32
    %c0_i32_1 = arith.constant 0 : i32
    return %c0_i32, %c0_i32_0 : i32, i32
  }
  func.func @transform_5(%arg0: i32) -> (i32, i32) {
    %c0_i32 = arith.constant 0 : i32
    %c0_i32_0 = arith.constant 0 : i32
    return %arg0, %c0_i32 : i32, i32
  }
}

</mosaic_0001>

<bundles_post_ra>
// kernel: tpu_custom_call.1
= control target key start
LH: loop header
LB: loop body
LE: loop exit
PB: predicated region body
PF: predicated region fallthrough
CT: control target
= control target key end

     0   :  { %10 = vsyncpa [#allocation3], 0  ;;  %s312_s18 = smov [#allocation2]   ;;  %s365_s0 = inlined_call_operand.vmem [shape: f32[8,4], index: 0, kind: input, shape index: {}]   ;;  %s366_s1 = inlined_call_operand.vmem [shape: f32[4,128], index: 1, kind: input, shape index: {}]   ;;  %s367_s2 = inlined_call_operand.vmem [shape: f32[1,128], index: 2, kind: input, shape index: {}]   ;;  %s368_s3 = inlined_call_operand.hbm [shape: f32[128,128], index: 3, kind: input, shape index: {}]   ;;  %s369_s4 = inlined_call_operand.vmem [shape: f32[1,128], index: 4, kind: input, shape index: {}]   ;;  %s370_s5 = inlined_call_operand.vmem [shape: f32[8,2], index: 5, kind: output, shape index: {}]  }
   0x1   :  { %s22_s19 = sshll.u32 %s312_s18, 4  ;;  %s23_s19 = int_to_ptr.vmem [resolvable:$true] %s22_s19 }
   0x2   :  { %s298_s20 = scalar_lea.vmem %s23_s19, 2048  ;;  %p303_p1 = scmp.lt.s32.totalorder %s23_s19, %s23_s19 }
   0x3   :  { %p299_p0 = scmp.ne.s32.totalorder %s23_s19, %s298_s20  ;;  %p304_p2 = scmp.lt.s32.totalorder %s298_s20, %s298_s20 }
   0x5   :  { %p305_p3 = por %p304_p2, %p303_p1 }
   0x7   :  { %p306_p4 = pnand %p305_p3, %p299_p0 }
   0x9   :  { %309 = shalt.err (!%p306_p4)
}
   0xa   :  { %s313_s21 = smov 128   ;;  %s314_s22 = smov 8  }
   0xb   :  { %28 = dma.hbm_to_vmem [thread:$0]  %s368_s3, 2048, %s23_s19, [#allocation3], %s313_s21, %s313_s21, %s314_s22  }
   0xc   :  { %310 = dma.done.wait [#allocation3], 2048  }
   0xd   :  { %311 = vsyncadd [#allocation3], 4294965248  ;;  %v315_v0 = vmov 0.0   ;;  %vm316_vm0 = vmmov 0   ;;  %vm47_vm1 = vcmask 1043456   ;;  %vm43_vm2 = vcmask 31744  }
   0xe   :  { %245 = vmatprep.subr.mxu0 %v315_v0  ;;  %247 = vmatprep.mubr.msk.f32.mxu0 %vm316_vm0, %v315_v0  ;;  %v35_v1 = vld [vmem:[%s366_s1] sm:$0xf]  ;;  %v137_v3 = vld [vmem:[#allocation2 + $0x78] sm:$0xff]  ;;  %v136_v4 = vld [vmem:[#allocation2 + $0x70] sm:$0xff]  ;;  %vm215_vm3 = vcmask 15360  }
   0xf   :  { %250 = vmatprep.subr.mxu1 %v315_v0  ;;  %282 = vmatprep.mubr.msk.f32.mxu1 %vm316_vm0, %v315_v0  ;;  %v34_v2 = vld [vmem:[%s365_s0] sm:$0xff]  ;;  %v135_v5 = vld [vmem:[#allocation2 + $0x68] sm:$0xff]  ;;  %v133_v7 = vld [vmem:[#allocation2 + $0x58] sm:$0xff] }
  0x10   :  { %246 = vmatpush3.msk.msra.mxu0 %vm47_vm1, %v35_v1  ;;  %251 = vmatpush3.msra.mxu1 %v137_v3  ;;  %v134_v6 = vld [vmem:[#allocation2 + $0x60] sm:$0xff]  ;;  %v132_v8 = vld [vmem:[#allocation2 + $0x50] sm:$0xff]  ;;  %v131_v9 = vld [vmem:[#allocation2 + $0x48] sm:$0xff] }
  0x11   :  { %248 = vmatmul.mubr.msk.f32.vlgmr.msra.gmra.mxu0 %vm43_vm2, %v34_v2  ;;  %252 = vmatprep.subr.mxu1 %v315_v0  ;;  %v130_v10 = vld [vmem:[#allocation2 + $0x40] sm:$0xff]  ;;  %v129_v11 = vld [vmem:[#allocation2 + $0x38] sm:$0xff]  ;;  %v128_v12 = vld [vmem:[#allocation2 + $0x30] sm:$0xff] }
  0x12   :  { %253 = vmatpush3.msra.mxu1 %v136_v4  ;;  %v127_v13 = vld [vmem:[#allocation2 + $0x28] sm:$0xff]  ;;  %v126_v14 = vld [vmem:[#allocation2 + $0x20] sm:$0xff]  ;;  %v125_v15 = vld [vmem:[#allocation2 + $0x18] sm:$0xff] }
  0x13   :  { %254 = vmatprep.subr.mxu1 %v315_v0  ;;  %v124_v16 = vld [vmem:[#allocation2 + $0x10] sm:$0xff]  ;;  %v123_v17 = vld [vmem:[#allocation2 + $0x8] sm:$0xff]  ;;  %v122_v18 = vld [vmem:[#allocation2] sm:$0xff] }
  0x14   :  { %255 = vmatpush3.msra.mxu1 %v135_v5  ;;  %v222_v19 = vld [vmem:[%s367_s2] ss:$0 sm:$0xff] }
  0x15   :  { %256 = vmatprep.subr.mxu1 %v315_v0  ;;  %v225_v24 = vld [vmem:[%s369_s4] ss:$0 sm:$0xff] }
  0x16   :  { %257 = vmatpush3.msra.mxu1 %v134_v6 }
  0x17   :  { %258 = vmatprep.subr.mxu1 %v315_v0 }
  0x18   :  { %259 = vmatpush3.msra.mxu1 %v133_v7 }
  0x19   :  { %260 = vmatprep.subr.mxu1 %v315_v0 }
  0x1a   :  { %261 = vmatpush3.msra.mxu1 %v132_v8 }
  0x1b   :  { %262 = vmatprep.subr.mxu1 %v315_v0 }
  0x1c   :  { %263 = vmatpush3.msra.mxu1 %v131_v9 }
  0x1d   :  { %264 = vmatprep.subr.mxu1 %v315_v0 }
  0x1e   :  { %265 = vmatpush3.msra.mxu1 %v130_v10 }
  0x1f   :  { %266 = vmatprep.subr.mxu1 %v315_v0 }
  0x20   :  { %267 = vmatpush3.msra.mxu1 %v129_v11 }
  0x21   :  { %268 = vmatprep.subr.mxu1 %v315_v0 }
  0x22   :  { %269 = vmatpush3.msra.mxu1 %v128_v12 }
  0x23   :  { %270 = vmatprep.subr.mxu1 %v315_v0 }
  0x24   :  { %271 = vmatpush3.msra.mxu1 %v127_v13 }
  0x25   :  { %272 = vmatprep.subr.mxu1 %v315_v0 }
  0x26   :  { %273 = vmatpush3.msra.mxu1 %v126_v14 }
  0x27   :  { %274 = vmatprep.subr.mxu1 %v315_v0 }
  0x28   :  { %275 = vmatpush3.msra.mxu1 %v125_v15 }
  0x29   :  { %276 = vmatprep.subr.mxu1 %v315_v0 }
  0x2a   :  { %277 = vmatpush3.msra.mxu1 %v124_v16 }
  0x2b   :  { %278 = vmatprep.subr.mxu1 %v315_v0 }
  0x2c   :  { %279 = vmatpush3.msra.mxu1 %v123_v17 }
  0x2d   :  { %280 = vmatprep.subr.mxu1 %v315_v0 }
  0x2e   :  { %281 = vmatpush3.msra.mxu1 %v122_v18 }
  0xd1   :  { %v117_v20 = vpop.f32.mrf.mxu0 }
  0xd2   :  { %v118_v21 = vadd.f32 %v222_v19, %v117_v20 }
  0xd3   :  { %v249_v22 = vpop.f32.mrf.mxu0 }
  0xd4   :  { %v121_v23 = vmax.f32 %v118_v21, 0.0 }
  0xd6   :  { %283 = vmatmul.mubr.f32.vlgmr.msra.gmra.mxu1 %v121_v23 }
 0x196   :  { %v211_v25 = vpop.f32.mrf.mxu1 }
 0x197   :  { %v212_v26 = vadd.f32 %v225_v24, %v211_v25 }
 0x198   :  { %v284_v27 = vpop.f32.mrf.mxu1 }
 0x199   :  { %216 = vst.msk [vmem:[%s370_s5] sm:$0xff] %vm215_vm3, %v212_v26 }
 0x19a   :  { %221 = vsyncpa [#allocation3], 1 }

</bundles_post_ra>
